<compile_context>
chip_gen: v7x
topology: tpu7x:2x2x1
jax: 0.10.0
libtpu: 0.0.40
codegen_flags: <defaults>
</compile_context>

<pallas_src>
import jax
import jax.numpy as jnp
from jax.experimental import pallas as pl
from jax.experimental.pallas import tpu as pltpu


def _sop_head_kernel(cls_ref, w_ref, b_ref, out_ref):
    # cls_ref: (tm, H) CLS tile;  w_ref: (2, H);  b_ref: (1, 2);  out_ref: (tm, 2)
    logits = jax.lax.dot_general(
        cls_ref[...], w_ref[...],
        dimension_numbers=(((1,), (1,)), ((), ())),   # contract H with H -> (tm, 2)
        preferred_element_type=jnp.float32)
    logits = logits + b_ref[...].astype(jnp.float32)  # broadcast (1, 2)
    out_ref[...] = logits.astype(out_ref.dtype)


def _choose_tm(B, H, itemsize, tm=None):
    """Batch tile: VMEM-safe on v7x, >= 2 blocks for the 2-TC split, 8-aligned."""
    if tm is not None:                            # explicit override, sanitized
        return B if tm >= B else max(8, (tm // 8) * 8)
    if B <= 16:                                   # tiny batch: one full-extent block
        return B
    # Double-buffered input (2 * tm * H * itemsize) capped at ~24 MiB so the
    # whole kernel stays inside v7x's 32 MiB scoped-VMEM default (weight is
    # only ~8*H*itemsize padded, output is tiny).
    vmem_budget = 24 * 1024 * 1024
    cap = max(8, (vmem_budget // (2 * H * itemsize)) // 8 * 8)
    half = -(-B // 2)                             # ceil(B / 2)
    half_aligned = ((half + 7) // 8) * 8          # 8-aligned -> grid has >= 2 blocks
    return max(8, min(cap, half_aligned))


def sop_head(hidden_states, weight, bias, *, tm=None):
    """hidden_states: (B, S, H); weight: (2, H) [PyTorch layout]; bias: (2,)."""
    B, S, H = hidden_states.shape
    itemsize = jnp.dtype(hidden_states.dtype).itemsize
    tm = _choose_tm(B, H, itemsize, tm)
    grid = (pl.cdiv(B, tm),)

    b2d = bias.reshape(1, 2)

    if (H % 128 == 0) or (S == 1):
        # Fused gather: (B, S, H) -> free (B, S*H) view; CLS token == cols [0, H).
        # BlockSpec (tm, H) at column-block 0 DMAs exactly the CLS rows (strided),
        # auto double-buffered by the pipeliner.
        x = hidden_states.reshape(B, S * H)
    else:
        # TODO(synk): H not lane-aligned -> the fused column-block would violate the
        # (8,128) block rule; fall back to a wrapper-side slice (correct, but pays
        # one extra (B, H) HBM round-trip).
        x = hidden_states[:, 0, :]

    return pl.pallas_call(
        _sop_head_kernel,
        out_shape=jax.ShapeDtypeStruct((B, 2), hidden_states.dtype),
        grid=grid,
        in_specs=[
            pl.BlockSpec((tm, H), lambda i: (i, 0)),    # CLS tile, pipelined
            pl.BlockSpec((2, H), lambda i: (0, 0)),     # weight, resident, PyTorch layout
            pl.BlockSpec((1, 2), lambda i: (0, 0)),     # bias, resident (tiny)
        ],
        out_specs=pl.BlockSpec((tm, 2), lambda i: (i, 0)),
        compiler_params=pltpu.CompilerParams(
            dimension_semantics=("parallel",)),         # v7x: split batch tiles across TCs
    )(x, weight, b2d)


if __name__ == "__main__":
    key = jax.random.PRNGKey(0)
    k_x, k_w, k_b, k_x2 = jax.random.split(key, 4)

    # Primary (fused-gather) path: lane-aligned hidden size.
    B, S, H = 4, 8, 128
    hidden_states = jax.random.normal(k_x, (B, S, H), dtype=jnp.float32)
    weight = jax.random.normal(k_w, (2, H), dtype=jnp.float32) * 0.02   # nn.Linear(H, 2) weight
    bias = jax.random.normal(k_b, (2,), dtype=jnp.float32) * 0.02

    out = jax.block_until_ready(sop_head(hidden_states, weight, bias))
    ref = hidden_states[:, 0, :] @ weight.T + bias
    assert out.shape == (B, 2)
    assert jnp.allclose(out, ref, atol=1e-5, rtol=1e-5)

    # Fallback path (H not a multiple of 128): wrapper-side CLS slice.
    B2, S2, H2 = 2, 8, 32
    hs2 = jax.random.normal(k_x2, (B2, S2, H2), dtype=jnp.float32)
    w2 = jax.random.normal(k_w, (2, H2), dtype=jnp.float32) * 0.02
    b2 = jax.random.normal(k_b, (2,), dtype=jnp.float32) * 0.02
    out2 = jax.block_until_ready(sop_head(hs2, w2, b2))
    ref2 = hs2[:, 0, :] @ w2.T + b2
    assert out2.shape == (B2, 2)
    assert jnp.allclose(out2, ref2, atol=1e-5, rtol=1e-5)

    print("KERNEL_OK")
</pallas_src>

<mosaic_0001>
module attributes {stable_mosaic.version = 11 : i64} {
  func.func @_sop_head_kernel(%arg0: i32, %arg1: memref<4x128xf32, #tpu.memory_space<vmem>>, %arg2: memref<2x128xf32, #tpu.memory_space<vmem>>, %arg3: memref<1x2xf32, #tpu.memory_space<vmem>>, %arg4: memref<4x2xf32, #tpu.memory_space<vmem>>) attributes {dimension_semantics = [#tpu.dimension_semantics<parallel>], iteration_bounds = array<i64: 1>, scalar_prefetch = 0 : i64, scratch_operands = 0 : i64, tpu.core_type = #tpu.core_type<tc>, window_params = [{transform_indices = @transform_0, window_bounds = array<i64: 4, 128>}, {pipeline_mode = #tpu.pipeline_mode<synchronous>, transform_indices = @transform_1, window_bounds = array<i64: 2, 128>}, {pipeline_mode = #tpu.pipeline_mode<synchronous>, transform_indices = @transform_2, window_bounds = array<i64: 1, 2>}, {transform_indices = @transform_3, window_bounds = array<i64: 4, 2>}]} {
    %c0 = arith.constant 0 : index
    %c0_0 = arith.constant 0 : index
    %0 = vector.load %arg1[%c0, %c0_0] : memref<4x128xf32, #tpu.memory_space<vmem>>, vector<4x128xf32>
    %c0_1 = arith.constant 0 : index
    %c0_2 = arith.constant 0 : index
    %1 = vector.load %arg2[%c0_1, %c0_2] : memref<2x128xf32, #tpu.memory_space<vmem>>, vector<2x128xf32>
    %cst = arith.constant dense<0.000000e+00> : vector<4x2xf32>
    %2 = tpu.matmul %0, %1, %cst {dimension_numbers = #tpu.dot_dimension_numbers<[1], [1], [0], [0], [0, 0, 1, 0], [], []>} : vector<4x128xf32>, vector<2x128xf32>, vector<4x2xf32> -> vector<4x2xf32>
    %c0_3 = arith.constant 0 : index
    %c0_4 = arith.constant 0 : index
    %3 = vector.load %arg3[%c0_3, %c0_4] : memref<1x2xf32, #tpu.memory_space<vmem>>, vector<1x2xf32>
    %4 = vector.broadcast %3 : vector<1x2xf32> to vector<4x2xf32>
    %5 = arith.addf %2, %4 : vector<4x2xf32>
    %c0_5 = arith.constant 0 : index
    %c0_6 = arith.constant 0 : index
    %6 = vector.load %arg4[%c0_5, %c0_6] : memref<4x2xf32, #tpu.memory_space<vmem>>, vector<4x2xf32>
    tpu.vector_store %arg4[%c0_5, %c0_6], %5 {strides = array<i32>} : memref<4x2xf32, #tpu.memory_space<vmem>>, vector<4x2xf32>,
    return
  }
  func.func @transform_0(%arg0: i32) -> (i32, i32) {
    %c0_i32 = arith.constant 0 : i32
    %c0_i32_0 = arith.constant 0 : i32
    return %arg0, %c0_i32 : i32, i32
  }
  func.func @transform_1(%arg0: i32) -> (i32, i32) {
    %c0_i32 = arith.constant 0 : i32
    %c0_i32_0 = arith.constant 0 : i32
    %c0_i32_1 = arith.constant 0 : i32
    return %c0_i32, %c0_i32_0 : i32, i32
  }
  func.func @transform_2(%arg0: i32) -> (i32, i32) {
    %c0_i32 = arith.constant 0 : i32
    %c0_i32_0 = arith.constant 0 : i32
    %c0_i32_1 = arith.constant 0 : i32
    return %c0_i32, %c0_i32_0 : i32, i32
  }
  func.func @transform_3(%arg0: i32) -> (i32, i32) {
    %c0_i32 = arith.constant 0 : i32
    %c0_i32_0 = arith.constant 0 : i32
    return %arg0, %c0_i32 : i32, i32
  }
}

</mosaic_0001>

<bundles_post_ra>
// kernel: tpu_custom_call.1
= control target key start
LH: loop header
LB: loop body
LE: loop exit
PB: predicated region body
PF: predicated region fallthrough
CT: control target
= control target key end

     0   :  { %8 = vsyncpa [#allocation3], 0  ;;  %s147_s12 = smov [#allocation2]   ;;  %s194_s0 = inlined_call_operand.hbm [shape: f32[4,1024], index: 0, kind: input, shape index: {}]   ;;  %s195_s1 = inlined_call_operand.vmem [shape: f32[2,128], index: 1, kind: input, shape index: {}]   ;;  %s196_s2 = inlined_call_operand.vmem [shape: f32[1,2], index: 2, kind: input, shape index: {}]   ;;  %s197_s3 = inlined_call_operand.vmem [shape: f32[4,2], index: 3, kind: output, shape index: {}]  }
   0x1   :  { %s15_s13 = sshll.u32 %s147_s12, 4  ;;  %s123_s16 = scalar_lea.hbm %s194_s0, 64  ;;  %s16_s13 = int_to_ptr.vmem [resolvable:$true] %s15_s13 }
   0x2   :  { %p124_p0 = scmp.ne.s32.totalorder %s194_s0, %s123_s16  ;;  %s125_s21 = scalar_lea.hbm %s194_s0, 512 }
   0x3   :  { %p126_p1 = scmp.lt.u32.totalorder %s125_s21, %s123_s16  ;;  %p127_p2 = scmp.lt.u32.totalorder %s123_s16, %s194_s0 }
   0x5   :  { %p128_p3 = por %p127_p2, %p126_p1 }
   0x7   :  { %p129_p4 = pnand %p128_p3, %p124_p0 }
   0x9   :  { %132 = shalt.err (!%p129_p4)
}
   0xa   :  { %s133_s24 = scalar_lea.vmem %s16_s13, 64  ;;  %p138_p6 = scmp.lt.s32.totalorder %s16_s13, %s16_s13 }
   0xb   :  { %p134_p5 = scmp.ne.s32.totalorder %s16_s13, %s133_s24  ;;  %p139_p7 = scmp.lt.s32.totalorder %s133_s24, %s133_s24 }
   0xd   :  { %p140_p8 = por %p139_p7, %p138_p6 }
   0xf   :  { %p141_p9 = pnand %p140_p8, %p134_p5 }
  0x11   :  { %144 = shalt.err (!%p141_p9)
}
  0x12   :  { %18 = dma.hbm_to_vmem [thread:$0]  %s194_s0, 64, %s16_s13, [#allocation3]  }
  0x13   :  { %145 = dma.done.wait [#allocation3], 64  }
  0x14   :  { %146 = vsyncadd [#allocation3], 4294967232  ;;  %v148_v0 = vmov 0.0   ;;  %vm149_vm0 = vmmov 0   ;;  %v27_v1 = vld [vmem:[%s195_s1] sm:$0x3] }
  0x15   :  { %115 = vmatprep.subr.mxu0 %v148_v0  ;;  %117 = vmatprep.mubr.msk.f32.mxu0 %vm149_vm0, %v148_v0  ;;  %v26_v2 = vld [vmem:[#allocation2] sm:$0xf]  ;;  %vm105_vm1 = vcmask 11264  }
  0x16   :  { %116 = vmatpush3.xpose.msra.mxu0 %v27_v1  ;;  %v112_v3 = vld [vmem:[%s196_s2] ss:$0 sm:$0xff] }
  0x19   :  { %118 = vmatmul.mubr.f32.vlgmr.msra.gmra.mrb[0].mxu0 %v26_v2 }
  0xec   :  { %v101_v4 = vpop.f32.mrb[0].mxu0 }
  0xed   :  { %v102_v5 = vadd.f32 %v112_v3, %v101_v4  ;;  %v119_v6 = vpop.f32.mrb[1].mxu0 }
  0xef   :  { %106 = vst.msk [vmem:[%s197_s3] sm:$0xf] %vm105_vm1, %v102_v5 }
  0xf0   :  { %111 = vsyncpa [#allocation3], 1 }

</bundles_post_ra>
